<compile_context>
chip_gen: v5e
topology: v5e:2x2
jax: 0.10.0
libtpu: 0.0.40
codegen_flags: <defaults>
</compile_context>

<pallas_src>
import math
import functools

import jax
import jax.numpy as jnp
from jax import lax
from jax.experimental import pallas as pl
from jax.experimental.pallas import tpu as pltpu


LANE = 128  # lane-padding width


def _round_up(x, m):
    return (x + m - 1) // m * m


# ---------------------------------------------------------------------------
# Kernel 1: MLP   z = relu(x @ W1 + b1) @ W2 + b2
# Row-tiled "parallel" grid, bf16 operands, f32 accumulation.
# ---------------------------------------------------------------------------
def _mlp_kernel(x_ref, w1_ref, b1_ref, w2_ref, b2_ref, z_ref):
    # TODO(synk): dropout is identity here (inference mode); training-mode
    # dropout masks were not reproduced.
    h = jnp.dot(x_ref[...], w1_ref[...], preferred_element_type=jnp.float32)
    h = jnp.maximum(h + b1_ref[...], 0.0)
    z = jnp.dot(h.astype(jnp.bfloat16), w2_ref[...],
                preferred_element_type=jnp.float32)
    z_ref[...] = z + b2_ref[...]


def _mlp(x_p, w1_p, b1_p, w2_p, b2_p, *, tm):
    n_pad, in_pad = x_p.shape
    hid_pad = w1_p.shape[1]
    out_pad = w2_p.shape[1]
    n_tiles = n_pad // tm
    ws = 2 * (tm * in_pad * 2 + in_pad * hid_pad * 2 + hid_pad * out_pad * 2
              + hid_pad * 4 + out_pad * 4 + tm * out_pad * 4)
    return pl.pallas_call(
        _mlp_kernel,
        out_shape=jax.ShapeDtypeStruct((n_pad, out_pad), jnp.float32),
        grid=(n_tiles,),
        in_specs=[
            pl.BlockSpec((tm, in_pad), lambda i: (i, 0)),
            pl.BlockSpec((in_pad, hid_pad), lambda i: (0, 0)),
            pl.BlockSpec((1, hid_pad), lambda i: (0, 0)),
            pl.BlockSpec((hid_pad, out_pad), lambda i: (0, 0)),
            pl.BlockSpec((1, out_pad), lambda i: (0, 0)),
        ],
        out_specs=pl.BlockSpec((tm, out_pad), lambda i: (i, 0)),
        compiler_params=pltpu.CompilerParams(
            dimension_semantics=("parallel",),
            vmem_limit_bytes=int(min(100 * 2**20, 2 * ws + (4 << 20)))),
    )(x_p, w1_p, b1_p, w2_p, b2_p)


# ---------------------------------------------------------------------------
# Kernel 2: Chebyshev heat diffusion + gamma mix + log_softmax.
#
# grid = (K, row_tiles); step k computes T_{k+1} for every row tile.
# lt2 = 2*L_tilde is either fully VMEM-resident (small graphs: constant
# index_map, loaded once) or streamed one (tm, N) row tile per grid point
# (large graphs: auto double-buffered).  The T history lives in persistent
# VMEM scratch:
#   t32[2]: f32 T history (exact subtraction operand)
#   t16[2]: bf16 T history (MXU RHS)
#   diff  : f32 accumulator of sum_k c_k * T_k
# Slot convention at step k (s = k % 2): slot 1-s holds T_k, slot s holds
# T_{k-1} (read, then overwritten with T_{k+1}).
# ---------------------------------------------------------------------------
def _diffusion_kernel(z_ref, lt2_ref, c0_ref, ck_ref, g0_ref, g1_ref, o_ref,
                      t32, t16, diff, *, K, tm, out_dim, lt_resident):
    k = pl.program_id(0)               # Chebyshev step: produces T_{k+1}
    i = pl.program_id(1)               # row tile
    r0 = pl.multiple_of(i * tm, tm)
    rows = pl.ds(r0, tm)

    # One-time init of the T_0 history (slot 1) with z (all rows).
    @pl.when(jnp.logical_and(k == 0, i == 0))
    def _():
        z_full = z_ref[...]
        t32[1] = z_full
        t16[1] = z_full.astype(jnp.bfloat16)

    z_i = z_ref[rows, :]               # (tm, out_pad) f32, resident
    ck_i = ck_ref[0]                   # (tm, 1)  = c_{k+1} for these rows
    if lt_resident:
        lt2_i = lt2_ref[rows, :]       # rows of the resident operator
    else:
        lt2_i = lt2_ref[...]           # streamed (tm, N_pad) bf16 row tile

    def commit(nxt, t_new, diff_new):
        diff[rows, :] = diff_new
        t32[nxt, rows, :] = t_new
        t16[nxt, rows, :] = t_new.astype(jnp.bfloat16)

    def do_step(cur, nxt, first_possible):
        # cur: slot holding T_k (bf16, all rows).  nxt: slot currently holding
        # T_{k-1} (f32) for these rows -> read before overwrite with T_{k+1}.
        acc = jnp.dot(lt2_i, t16[cur], preferred_element_type=jnp.float32)
        if first_possible:
            @pl.when(k == 0)
            def _():
                # T_1 = 0.5 * (2 L~) T_0 ; diff = c_0 z + c_1 T_1
                t_new = 0.5 * acc
                commit(nxt, t_new, c0_ref[...] * z_i + ck_i * t_new)

            @pl.when(k != 0)
            def _():
                t_new = acc - t32[nxt, rows, :]
                commit(nxt, t_new, diff[rows, :] + ck_i * t_new)
        else:
            t_new = acc - t32[nxt, rows, :]
            commit(nxt, t_new, diff[rows, :] + ck_i * t_new)

    s = k % 2

    @pl.when(s == 0)
    def _():
        do_step(1, 0, True)

    @pl.when(s == 1)
    def _():
        do_step(0, 1, False)

    # Finalize: gamma mix + log_softmax over the real classes (padded lanes
    # masked to -1e30 so they contribute exp(...) == 0).
    @pl.when(k == K - 1)
    def _():
        out = g0_ref[...] * z_i + g1_ref[...] * diff[rows, :]
        col = lax.broadcasted_iota(jnp.int32, out.shape, 1)
        out = jnp.where(col < out_dim, out, -1e30)
        m = jnp.max(out, axis=1, keepdims=True)
        sh = out - m
        lse = jnp.log(jnp.sum(jnp.exp(sh), axis=1, keepdims=True))
        o_ref[rows, :] = sh - lse


def _diffusion(z_p, lt2_p, c0_p, ck_p, g0_p, g1_p, *, K, tm, out_dim):
    n_pad, out_pad = z_p.shape
    n_tiles = n_pad // tm

    # Resident working set (z + out assumed double-buffered, T history, diff,
    # small blocked coefficient inputs).
    resid = (n_pad * out_pad * (2 * 4 + 2 * 4 + 2 * 4 + 2 * 2 + 4)
             + 64 * tm * 4)
    lt_bytes = n_pad * n_pad * 2
    # Keep the operator resident when even a (conservative) 2x allocation of it
    # plus the residents fits in a budget safe on all chips (v7x has 64 MiB).
    lt_resident = (2 * lt_bytes + resid) <= (32 << 20)

    if lt_resident:
        lt_spec = pl.BlockSpec((n_pad, n_pad), lambda k, i: (0, 0))
        ws = 2 * lt_bytes + resid
    else:
        lt_spec = pl.BlockSpec((tm, n_pad), lambda k, i: (i, 0))
        ws = 2 * tm * n_pad * 2 + resid

    kernel = functools.partial(_diffusion_kernel, K=K, tm=tm, out_dim=out_dim,
                               lt_resident=lt_resident)
    return pl.pallas_call(
        kernel,
        out_shape=jax.ShapeDtypeStruct((n_pad, out_pad), jnp.float32),
        grid=(K, n_tiles),
        in_specs=[
            pl.BlockSpec((n_pad, out_pad), lambda k, i: (0, 0)),   # z (resident)
            lt_spec,                                               # 2*L_tilde
            pl.BlockSpec((tm, 1), lambda k, i: (i, 0)),            # c_0
            pl.BlockSpec((1, tm, 1), lambda k, i: (k, i, 0)),      # c_{k+1}
            pl.BlockSpec((tm, 1), lambda k, i: (i, 0)),            # gamma0
            pl.BlockSpec((tm, 1), lambda k, i: (i, 0)),            # gamma1
        ],
        out_specs=pl.BlockSpec((n_pad, out_pad), lambda k, i: (0, 0)),
        scratch_shapes=[
            pltpu.VMEM((2, n_pad, out_pad), jnp.float32),
            pltpu.VMEM((2, n_pad, out_pad), jnp.bfloat16),
            pltpu.VMEM((n_pad, out_pad), jnp.float32),
        ],
        compiler_params=pltpu.CompilerParams(
            dimension_semantics=("arbitrary", "arbitrary"),
            vmem_limit_bytes=int(min(100 * 2**20, ws + (8 << 20)))),
    )(z_p, lt2_p, c0_p, ck_p, g0_p, g1_p)


# ---------------------------------------------------------------------------
# Wrapper: padding, dtype casts, reshapes; calls the two kernels.
# ---------------------------------------------------------------------------
def lhkgnn_forward(x, w1, b1, w2, b2, l_tilde, c, gamma0, gamma1, *, K):
    assert K >= 1
    N, in_dim = x.shape
    hidden = w1.shape[1]
    out_dim = w2.shape[1]

    in_pad = _round_up(in_dim, LANE)
    hid_pad = _round_up(hidden, LANE)
    out_pad = _round_up(out_dim, LANE)
    tm = 128 if N >= 128 else _round_up(N, 8)
    n_pad = _round_up(N, tm)

    f32, bf16 = jnp.float32, jnp.bfloat16

    def pad2(a, r, ccols):
        return jnp.zeros((r, ccols), f32).at[:a.shape[0], :a.shape[1]].set(a)

    # MLP operands (padded columns are zero -> padded z columns are exactly 0).
    x_p = pad2(x, n_pad, in_pad).astype(bf16)
    w1_p = pad2(w1, in_pad, hid_pad).astype(bf16)
    b1_p = pad2(b1, 1, hid_pad)
    w2_p = pad2(w2, hid_pad, out_pad).astype(bf16)
    b2_p = pad2(b2, 1, out_pad)

    z_p = _mlp(x_p, w1_p, b1_p, w2_p, b2_p, tm=tm)           # (n_pad, out_pad) f32

    # Diffusion operands. Chebyshev 2x folded into the operator once.
    lt2_p = pad2(2.0 * l_tilde, n_pad, n_pad).astype(bf16)
    c0_p = pad2(c[:, :1], n_pad, 1)
    ck_p = jnp.zeros((K, n_pad, 1), f32).at[:, :N, 0].set(c[:, 1:].T)
    g0_p = pad2(gamma0, n_pad, 1)
    g1_p = pad2(gamma1, n_pad, 1)

    out_p = _diffusion(z_p, lt2_p, c0_p, ck_p, g0_p, g1_p,
                       K=K, tm=tm, out_dim=out_dim)
    return out_p[:N, :out_dim]


# ---------------------------------------------------------------------------
# Glue: Bessel coefficients (Taylor fallback, matching bessel_iv_approx)
# ---------------------------------------------------------------------------
def bessel_iv_approx(k, x, terms=10):
    result = jnp.zeros_like(x)
    for m in range(terms):
        fact_m = jnp.exp(jax.scipy.special.gammaln(float(m) + 1.0))
        fact_mk = jnp.exp(jax.scipy.special.gammaln(float(m + k) + 1.0))
        denom = fact_m * fact_mk
        term = x ** (2 * m + k) / (denom * (2.0 ** (2 * m + k)))
        result = result + term
    return result


# ---------------------------------------------------------------------------
# References
# ---------------------------------------------------------------------------
def _reference_f32(x, w1, b1, w2, b2, lt, c, g0, g1, K):
    h = jnp.maximum(x @ w1 + b1, 0.0)
    z = h @ w2 + b2
    t_prev, t_curr = z, lt @ z
    diff = c[:, :1] * z + c[:, 1:2] * t_curr
    for k in range(2, K + 1):
        t_next = 2.0 * (lt @ t_curr) - t_prev
        diff = diff + c[:, k:k + 1] * t_next
        t_prev, t_curr = t_curr, t_next
    out = g0 * z + g1 * diff
    return jax.nn.log_softmax(out, axis=1)


def _reference_bf16(x, w1, b1, w2, b2, lt, c, g0, g1, K):
    # Mirrors the kernel's numerics: bf16 matmul operands, f32 accumulation.
    bf = jnp.bfloat16
    h = jnp.maximum(
        jnp.dot(x.astype(bf), w1.astype(bf),
                preferred_element_type=jnp.float32) + b1, 0.0)
    z = jnp.dot(h.astype(bf), w2.astype(bf),
                preferred_element_type=jnp.float32) + b2
    lt_b = lt.astype(bf)
    t_prev = z
    t_curr = jnp.dot(lt_b, z.astype(bf), preferred_element_type=jnp.float32)
    diff = c[:, :1] * z + c[:, 1:2] * t_curr
    for k in range(2, K + 1):
        t_next = 2.0 * jnp.dot(lt_b, t_curr.astype(bf),
                               preferred_element_type=jnp.float32) - t_prev
        diff = diff + c[:, k:k + 1] * t_next
        t_prev, t_curr = t_curr, t_next
    out = g0 * z + g1 * diff
    return jax.nn.log_softmax(out, axis=1)


if __name__ == "__main__":
    key = jax.random.PRNGKey(0)
    N, in_dim, hidden, out_dim, K = 8, 16, 32, 8, 10
    node_t_init = 0.1

    ks = jax.random.split(key, 8)

    x = jax.random.normal(ks[0], (N, in_dim), dtype=jnp.float32)

    w1 = jax.random.uniform(ks[1], (in_dim, hidden), jnp.float32,
                            -1.0 / math.sqrt(in_dim), 1.0 / math.sqrt(in_dim))
    b1 = jax.random.uniform(ks[2], (1, hidden), jnp.float32,
                            -1.0 / math.sqrt(in_dim), 1.0 / math.sqrt(in_dim))
    w2 = jax.random.uniform(ks[3], (hidden, out_dim), jnp.float32,
                            -1.0 / math.sqrt(hidden), 1.0 / math.sqrt(hidden))
    b2 = jax.random.uniform(ks[4], (1, out_dim), jnp.float32,
                            -1.0 / math.sqrt(hidden), 1.0 / math.sqrt(hidden))

    node_t = jax.random.uniform(ks[5], (N,), jnp.float32) * 2.0 * node_t_init
    gamma0 = jnp.ones((N, 1), jnp.float32)
    gamma1 = jnp.ones((N, 1), jnp.float32)

    # Deterministic small graph: bidirectional ring.
    row = jnp.array(list(range(N)) + [(i + 1) % N for i in range(N)], jnp.int32)
    col = jnp.array([(i + 1) % N for i in range(N)] + list(range(N)), jnp.int32)
    edge_weight = jnp.ones(row.shape[0], jnp.float32)

    deg = jnp.zeros((N,), jnp.float32).at[row].add(1.0)
    deg_inv_sqrt = deg ** -0.5
    a_vals = deg_inv_sqrt[row] * edge_weight * deg_inv_sqrt[col]
    a_norm = jnp.zeros((N, N), jnp.float32).at[row, col].add(a_vals)
    l_tilde = -a_norm                                   # L_tilde = -A_norm

    # Per-node Chebyshev coefficients c_k(t_i), t = relu(node_t).
    t = jnp.maximum(node_t, 0.0)
    c_cols = [jnp.exp(-t) * bessel_iv_approx(0, t)]
    for k in range(1, K + 1):
        c_cols.append(2.0 * jnp.exp(-t) * ((-1.0) ** k) * bessel_iv_approx(k, t))
    c = jnp.stack(c_cols, axis=1).astype(jnp.float32)   # (N, K+1)

    out = lhkgnn_forward(x, w1, b1, w2, b2, l_tilde, c, gamma0, gamma1, K=K)
    out = jax.block_until_ready(out)

    ref16 = _reference_bf16(x, w1, b1, w2, b2, l_tilde, c, gamma0, gamma1, K)
    ref32 = _reference_f32(x, w1, b1, w2, b2, l_tilde, c, gamma0, gamma1, K)

    assert out.shape == (N, out_dim)
    assert jnp.allclose(out, ref16, atol=2e-3, rtol=2e-3), \
        "mismatch vs bf16-operand reference"
    assert jnp.allclose(out, ref32, atol=5e-2, rtol=5e-2), \
        "mismatch vs f32 reference"

    print("KERNEL_OK")
</pallas_src>

<mosaic_0001>
module attributes {stable_mosaic.version = 11 : i64} {
  func.func @_mlp_kernel(%arg0: i32, %arg1: memref<8x128xbf16, #tpu.memory_space<vmem>>, %arg2: memref<128x128xbf16, #tpu.memory_space<vmem>>, %arg3: memref<1x128xf32, #tpu.memory_space<vmem>>, %arg4: memref<128x128xbf16, #tpu.memory_space<vmem>>, %arg5: memref<1x128xf32, #tpu.memory_space<vmem>>, %arg6: memref<8x128xf32, #tpu.memory_space<vmem>>) attributes {dimension_semantics = [#tpu.dimension_semantics<parallel>], iteration_bounds = array<i64: 1>, scalar_prefetch = 0 : i64, scratch_operands = 0 : i64, tpu.core_type = #tpu.core_type<tc>, window_params = [{transform_indices = @transform_0, window_bounds = array<i64: 8, 128>}, {pipeline_mode = #tpu.pipeline_mode<synchronous>, transform_indices = @transform_1, window_bounds = array<i64: 128, 128>}, {pipeline_mode = #tpu.pipeline_mode<synchronous>, transform_indices = @transform_2, window_bounds = array<i64: 1, 128>}, {pipeline_mode = #tpu.pipeline_mode<synchronous>, transform_indices = @transform_3, window_bounds = array<i64: 128, 128>}, {pipeline_mode = #tpu.pipeline_mode<synchronous>, transform_indices = @transform_4, window_bounds = array<i64: 1, 128>}, {transform_indices = @transform_5, window_bounds = array<i64: 8, 128>}]} {
    %c0 = arith.constant 0 : index
    %c0_0 = arith.constant 0 : index
    %0 = vector.load %arg1[%c0, %c0_0] : memref<8x128xbf16, #tpu.memory_space<vmem>>, vector<8x128xbf16>
    %c0_1 = arith.constant 0 : index
    %c0_2 = arith.constant 0 : index
    %1 = vector.load %arg2[%c0_1, %c0_2] : memref<128x128xbf16, #tpu.memory_space<vmem>>, vector<128x128xbf16>
    %cst = arith.constant dense<0.000000e+00> : vector<8x128xf32>
    %2 = tpu.matmul %0, %1, %cst {dimension_numbers = #tpu.dot_dimension_numbers<[1], [0], [0], [1], [0, 0, 1, 1], [], []>} : vector<8x128xbf16>, vector<128x128xbf16>, vector<8x128xf32> -> vector<8x128xf32>
    %c0_3 = arith.constant 0 : index
    %c0_4 = arith.constant 0 : index
    %3 = vector.load %arg3[%c0_3, %c0_4] : memref<1x128xf32, #tpu.memory_space<vmem>>, vector<1x128xf32>
    %4 = vector.broadcast %3 : vector<1x128xf32> to vector<8x128xf32>
    %5 = arith.addf %2, %4 : vector<8x128xf32>
    %cst_5 = arith.constant 0.000000e+00 : f32
    %6 = vector.broadcast %cst_5 : f32 to vector<8x128xf32>
    %7 = arith.maximumf %5, %6 : vector<8x128xf32>
    %8 = arith.truncf %7 : vector<8x128xf32> to vector<8x128xbf16>
    %c0_6 = arith.constant 0 : index
    %c0_7 = arith.constant 0 : index
    %9 = vector.load %arg4[%c0_6, %c0_7] : memref<128x128xbf16, #tpu.memory_space<vmem>>, vector<128x128xbf16>
    %cst_8 = arith.constant dense<0.000000e+00> : vector<8x128xf32>
    %10 = tpu.matmul %8, %9, %cst_8 {dimension_numbers = #tpu.dot_dimension_numbers<[1], [0], [0], [1], [0, 0, 1, 1], [], []>} : vector<8x128xbf16>, vector<128x128xbf16>, vector<8x128xf32> -> vector<8x128xf32>
    %c0_9 = arith.constant 0 : index
    %c0_10 = arith.constant 0 : index
    %11 = vector.load %arg5[%c0_9, %c0_10] : memref<1x128xf32, #tpu.memory_space<vmem>>, vector<1x128xf32>
    %12 = vector.broadcast %11 : vector<1x128xf32> to vector<8x128xf32>
    %13 = arith.addf %10, %12 : vector<8x128xf32>
    %c0_11 = arith.constant 0 : index
    %c0_12 = arith.constant 0 : index
    %14 = vector.load %arg6[%c0_11, %c0_12] : memref<8x128xf32, #tpu.memory_space<vmem>>, vector<8x128xf32>
    tpu.vector_store %arg6[%c0_11, %c0_12], %13 {strides = array<i32>} : memref<8x128xf32, #tpu.memory_space<vmem>>, vector<8x128xf32>,
    return
  }
  func.func @transform_0(%arg0: i32) -> (i32, i32) {
    %c0_i32 = arith.constant 0 : i32
    %c0_i32_0 = arith.constant 0 : i32
    return %arg0, %c0_i32 : i32, i32
  }
  func.func @transform_1(%arg0: i32) -> (i32, i32) {
    %c0_i32 = arith.constant 0 : i32
    %c0_i32_0 = arith.constant 0 : i32
    %c0_i32_1 = arith.constant 0 : i32
    return %c0_i32, %c0_i32_0 : i32, i32
  }
  func.func @transform_2(%arg0: i32) -> (i32, i32) {
    %c0_i32 = arith.constant 0 : i32
    %c0_i32_0 = arith.constant 0 : i32
    %c0_i32_1 = arith.constant 0 : i32
    return %c0_i32, %c0_i32_0 : i32, i32
  }
  func.func @transform_3(%arg0: i32) -> (i32, i32) {
    %c0_i32 = arith.constant 0 : i32
    %c0_i32_0 = arith.constant 0 : i32
    %c0_i32_1 = arith.constant 0 : i32
    return %c0_i32, %c0_i32_0 : i32, i32
  }
  func.func @transform_4(%arg0: i32) -> (i32, i32) {
    %c0_i32 = arith.constant 0 : i32
    %c0_i32_0 = arith.constant 0 : i32
    %c0_i32_1 = arith.constant 0 : i32
    return %c0_i32, %c0_i32_0 : i32, i32
  }
  func.func @transform_5(%arg0: i32) -> (i32, i32) {
    %c0_i32 = arith.constant 0 : i32
    %c0_i32_0 = arith.constant 0 : i32
    return %arg0, %c0_i32 : i32, i32
  }
}

</mosaic_0001>

<bundles_post_ra>
// kernel: tpu_custom_call.1
= control target key start
LH: loop header
LB: loop body
LE: loop exit
PB: predicated region body
PF: predicated region fallthrough
CT: control target
= control target key end

     0   :  { %10 = vsyncpa [#allocation3], 0  ;;  %s494_s0 = inlined_call_operand.hbm [shape: bf16[8,128], index: 0, kind: input, shape index: {}]   ;;  %s495_s1 = inlined_call_operand.hbm [shape: bf16[128,128], index: 1, kind: input, shape index: {}]   ;;  %s496_s2 = inlined_call_operand.vmem [shape: f32[1,128], index: 2, kind: input, shape index: {}]   ;;  %s497_s3 = inlined_call_operand.hbm [shape: bf16[128,128], index: 3, kind: input, shape index: {}]   ;;  %s498_s4 = inlined_call_operand.vmem [shape: f32[1,128], index: 4, kind: input, shape index: {}]   ;;  %s499_s5 = inlined_call_operand.hbm [shape: f32[8,128], index: 5, kind: output, shape index: {}]  }
   0x1   :  { %11 = vsyncpa [#allocation6], 0  ;;  %s28_s20 = sshll.u32 %s495_s1, 4  ;;  %s29_s20 = int_to_ptr.hbm [resolvable:$true] %s28_s20 }
   0x2   :  { %12 = vsyncpa [#allocation4], 0  ;;  %s440_s21 = smov [#allocation5]   ;;  %s18_s25 = sshll.u32 %s494_s0, 4  ;;  %s19_s25 = int_to_ptr.hbm [resolvable:$true] %s18_s25 }
   0x3   :  { %s30_s22 = sshll.u32 %s440_s21, 4  ;;  %s441_s26 = smov 64   ;;  %s31_s22 = int_to_ptr.vmem [resolvable:$true] %s30_s22 }
   0x4   :  { %s442_s27 = smov 4   ;;  %s443_s28 = smov [#allocation2]  }
   0x5   :  { %36 = dma.hbm_to_vmem [thread:$0]  %s29_s20, 1024, %s31_s22, [#allocation6], %s441_s26, %s441_s26, %s442_s27  }
   0x6   :  { %s20_s29 = sshll.u32 %s443_s28, 4  ;;  %s43_s7 = sshll.u32 %s497_s3, 4  ;;  %s21_s29 = int_to_ptr.vmem [resolvable:$true] %s20_s29  ;;  %s44_s7 = int_to_ptr.hbm [resolvable:$true] %s43_s7 }
   0x7   :  { %23 = dma.hbm_to_vmem [thread:$0]  %s19_s25, 64, %s21_s29, [#allocation3]  }
   0x8   :  { %s444_s1 = smov [#allocation7]  }
   0x9   :  { %s45_s8 = sshll.u32 %s444_s1, 4  ;;  %s46_s8 = int_to_ptr.vmem [resolvable:$true] %s45_s8 }
   0xa   :  { %51 = dma.hbm_to_vmem [thread:$0]  %s44_s7, 1024, %s46_s8, [#allocation6], %s441_s26, %s441_s26, %s442_s27  }
   0xb   :  { %434 = dma.done.wait [#allocation3], 64  }
   0xc   :  { %435 = vsyncadd [#allocation3], 4294967232 }
   0xd   :  { %436 = dma.done.wait [#allocation6], 2048  }
   0xe   :  { %437 = vsyncadd [#allocation6], 4294965248  ;;  %v321_v0 = vld [vmem:[#allocation5 + $0x38] sm:$0xff]  ;;  %v320_v1 = vld [vmem:[#allocation5 + $0x30] sm:$0xff]  ;;  %s445_s11 = smov [#allocation8]   ;;  %s239_s15 = sshll.u32 %s499_s5, 4  ;;  %s240_s15 = int_to_ptr.hbm [resolvable:$true] %s239_s15 }
   0xf   :  { %135 = vmatpush.bf16.msra.mxu0 %v321_v0  ;;  %v329_v2 = vld [vmem:[#allocation7 + $0x38] sm:$0xff]  ;;  %v328_v3 = vld [vmem:[#allocation7 + $0x30] sm:$0xff]  ;;  %v319_v4 = vld [vmem:[#allocation5 + $0x28] sm:$0xff]  ;;  %s237_s12 = sshll.u32 %s445_s11, 4  ;;  %s238_s12 = int_to_ptr.vmem [resolvable:$true] %s237_s12 }
  0x10   :  { %218 = vmatpush.bf16.msra.mxu1 %v329_v2  ;;  %v327_v5 = vld [vmem:[#allocation7 + $0x28] sm:$0xff]  ;;  %v318_v6 = vld [vmem:[#allocation5 + $0x20] sm:$0xff]  ;;  %v317_v8 = vld [vmem:[#allocation5 + $0x18] sm:$0xff] }
  0x11   :  { %v326_v7 = vld [vmem:[#allocation7 + $0x20] sm:$0xff]  ;;  %v325_v9 = vld [vmem:[#allocation7 + $0x18] sm:$0xff]  ;;  %v316_v10 = vld [vmem:[#allocation5 + $0x10] sm:$0xff] }
  0x12   :  { %v324_v11 = vld [vmem:[#allocation7 + $0x10] sm:$0xff]  ;;  %v315_v12 = vld [vmem:[#allocation5 + $0x8] sm:$0xff]  ;;  %v314_v13 = vld [vmem:[#allocation5] sm:$0xff] }
  0x13   :  { %136 = vmatpush.bf16.msra.mxu0 %v320_v1  ;;  %v66_v14 = vld [vmem:[#allocation2] sm:$0xf]  ;;  %v323_v15 = vld [vmem:[#allocation7 + $0x8] sm:$0xff]  ;;  %v322_v16 = vld [vmem:[#allocation7] sm:$0xff] }
  0x14   :  { %219 = vmatpush.bf16.msra.mxu1 %v328_v3  ;;  %v336_v17 = vld [vmem:[%s496_s2] ss:$0 sm:$0xff] }
  0x15   :  { %v337_v23 = vld [vmem:[%s498_s4] ss:$0 sm:$0xff] }
  0x17   :  { %137 = vmatpush.bf16.msra.mxu0 %v319_v4 }
  0x18   :  { %220 = vmatpush.bf16.msra.mxu1 %v327_v5 }
  0x1b   :  { %138 = vmatpush.bf16.msra.mxu0 %v318_v6 }
  0x1c   :  { %221 = vmatpush.bf16.msra.mxu1 %v326_v7 }
  0x1f   :  { %139 = vmatpush.bf16.msra.mxu0 %v317_v8 }
  0x20   :  { %222 = vmatpush.bf16.msra.mxu1 %v325_v9 }
  0x23   :  { %140 = vmatpush.bf16.msra.mxu0 %v316_v10 }
  0x24   :  { %223 = vmatpush.bf16.msra.mxu1 %v324_v11 }
  0x27   :  { %141 = vmatpush.bf16.msra.mxu0 %v315_v12 }
  0x28   :  { %224 = vmatpush.bf16.msra.mxu1 %v323_v15 }
  0x2b   :  { %142 = vmatpush.bf16.msra.mxu0 %v314_v13 }
  0x2c   :  { %225 = vmatpush.bf16.msra.mxu1 %v322_v16 }
  0x2e   :  { %143 = vmatmul.bf16.vlgmr.msra.gmra.mxu0 %v66_v14 }
  0xab   :  { %v144_v18 = vpop.f32.mrf.mxu0 }
  0xac   :  { %v145_v19 = vadd.f32 %v336_v17, %v144_v18 }
  0xae   :  { %v148_v20 = vmax.f32 %v145_v19, 0.0 }
  0xb0   :  { %v149_v21 = vpack.c.bf16 %v148_v20, %v148_v20 }
  0xb2   :  { %226 = vmatmul.bf16.vlgmr.msra.gmra.mxu1 %v149_v21 }
  0xb3   :  { %v146_v22 = vpop.f32.mrf.mxu0 }
 0x12f   :  { %v227_v24 = vpop.f32.mrf.mxu1 }
 0x130   :  { %v228_v25 = vadd.f32 %v337_v23, %v227_v24 }
 0x132   :  { %231 = vst [vmem:[#allocation8] sm:$0xff] %v228_v25 }
 0x133   :  { %242 = dma.vmem_to_hbm [thread:$0]  %s238_s12, 128, %s240_s15, [#allocation4]  }
 0x137   :  { %v229_v26 = vpop.f32.mrf.mxu1 }
 0x138   :  { %438 = dma.done.wait [#allocation4], 128  }
 0x139   :  { %439 = vsyncadd [#allocation4], 4294967168 }
 0x13a   :  { %247 = vsyncpa [#allocation3], 1 }
 0x13b   :  { %248 = vsyncpa [#allocation6], 1 }
 0x13c   :  { %249 = vsyncpa [#allocation4], 1 }

</bundles_post_ra>
